<compile_context>
chip_gen: v7x
topology: tpu7x:2x2x1
jax: 0.10.0
libtpu: 0.0.40
codegen_flags: <defaults>
</compile_context>

<pallas_src>
import functools

import jax
import jax.numpy as jnp
from jax.experimental import pallas as pl
from jax.experimental.pallas import tpu as pltpu


def _cross_stencil_kernel(x_ref, w_ref, m_ref, o_ref, *, width):
    """Depthwise 3x3 cross stencil on a lane-flattened (rows, H*W) tile.

    x_ref : (Rb, H*W) f32  rows = flattened (batch, channel)
    w_ref : (Rb, 1)   f32  per-row (= per-channel) scale
    m_ref : (4, H*W)  f32  boundary masks [up, down, left, right]
    o_ref : (Rb, H*W) f32
    """
    x = x_ref[...]                      # (Rb, HW)
    m = m_ref[...]                      # (4, HW)

    # Lane rolls along the flattened H*W axis (XLU work); wrap-around values
    # are zeroed by the hoisted boundary masks.  (pltpu.roll would also work;
    # jnp.roll keeps the semantics unambiguous.)
    up    = jnp.roll(x,  width, axis=1) * m[0:1, :]   # x[h-1, w]
    down  = jnp.roll(x, -width, axis=1) * m[1:2, :]   # x[h+1, w]
    left  = jnp.roll(x,  1,     axis=1) * m[2:3, :]   # x[h,   w-1]
    right = jnp.roll(x, -1,     axis=1) * m[3:4, :]   # x[h,   w+1]

    acc = (up + down) + (left + right)                # (Rb, HW)
    o_ref[...] = acc * w_ref[...]                     # (Rb, 1) broadcasts


def conv_cross_depthwise(x, weights, *, row_block=64):
    """x: (N, C, H, W) float32, weights: (C,) float32 -> (N, C, H, W)."""
    N, C, H, W = x.shape
    HW = H * W
    R = N * C

    x2 = x.astype(jnp.float32).reshape(R, HW)                 # free reshape
    w_col = jnp.tile(weights.astype(jnp.float32), N).reshape(R, 1)

    # Hoisted boundary masks over the flattened H*W lane axis.
    flat = jnp.arange(HW, dtype=jnp.int32)
    hpos = flat // W
    wpos = flat % W
    masks = jnp.stack(
        [hpos > 0, hpos < H - 1, wpos > 0, wpos < W - 1]
    ).astype(jnp.float32)                                     # (4, HW)

    row_block = min(row_block, R)
    assert R % row_block == 0, "N*C must be divisible by row_block"
    grid = (R // row_block,)

    out2 = pl.pallas_call(
        functools.partial(_cross_stencil_kernel, width=W),
        out_shape=jax.ShapeDtypeStruct((R, HW), jnp.float32),
        grid_spec=pltpu.PrefetchScalarGridSpec(
            num_scalar_prefetch=0,
            grid=grid,
            in_specs=[
                pl.BlockSpec((row_block, HW), lambda i: (i, 0)),
                pl.BlockSpec((row_block, 1), lambda i: (i, 0)),
                pl.BlockSpec((4, HW), lambda i: (0, 0)),
            ],
            out_specs=pl.BlockSpec((row_block, HW), lambda i: (i, 0)),
        ),
        compiler_params=pltpu.CompilerParams(
            dimension_semantics=("parallel",)
        ),
    )(x2, w_col, masks)

    return out2.reshape(N, C, H, W)


def _reference(x, weights):
    # Plain-JAX reference of the same depthwise cross-stencil conv.
    xp = jnp.pad(x, ((0, 0), (0, 0), (1, 1), (1, 1)))
    acc = (xp[:, :, :-2, 1:-1] + xp[:, :, 2:, 1:-1]
           + xp[:, :, 1:-1, :-2] + xp[:, :, 1:-1, 2:])
    return acc * weights[None, :, None, None]


if __name__ == "__main__":
    key = jax.random.PRNGKey(0)
    N, C, H, W = 2, 64, 16, 16          # C must be 64 (groups=64, 64 weights)
    x = jax.random.normal(key, (N, C, H, W), dtype=jnp.float32)

    # Deterministic parameter init, matching the module's __init__ (all ones).
    weights = jnp.ones((C,), dtype=jnp.float32)

    out = conv_cross_depthwise(x, weights)
    out = jax.block_until_ready(out)

    ref = _reference(x, weights)
    assert out.shape == (N, C, H, W)
    assert jnp.allclose(out, ref, atol=1e-5, rtol=1e-5)

    print("KERNEL_OK")
</pallas_src>

<mosaic_0001>
module attributes {stable_mosaic.version = 11 : i64} {
  func.func @_cross_stencil_kernel(%arg0: i32, %arg1: memref<64x256xf32, #tpu.memory_space<vmem>>, %arg2: memref<64x1xf32, #tpu.memory_space<vmem>>, %arg3: memref<4x256xf32, #tpu.memory_space<vmem>>, %arg4: memref<64x256xf32, #tpu.memory_space<vmem>>) attributes {dimension_semantics = [#tpu.dimension_semantics<parallel>], iteration_bounds = array<i64: 2>, scalar_prefetch = 0 : i64, scratch_operands = 0 : i64, tpu.core_type = #tpu.core_type<tc>, window_params = [{transform_indices = @transform_0, window_bounds = array<i64: 64, 256>}, {transform_indices = @transform_1, window_bounds = array<i64: 64, 1>}, {pipeline_mode = #tpu.pipeline_mode<synchronous>, transform_indices = @transform_2, window_bounds = array<i64: 4, 256>}, {transform_indices = @transform_3, window_bounds = array<i64: 64, 256>}]} {
    %c0 = arith.constant 0 : index
    %c0_0 = arith.constant 0 : index
    %0 = vector.load %arg1[%c0, %c0_0] : memref<64x256xf32, #tpu.memory_space<vmem>>, vector<64x256xf32>
    %c0_1 = arith.constant 0 : index
    %c0_2 = arith.constant 0 : index
    %1 = vector.load %arg3[%c0_1, %c0_2] : memref<4x256xf32, #tpu.memory_space<vmem>>, vector<4x256xf32>
    %2 = vector.extract_strided_slice %0 {offsets = [0, 240], sizes = [64, 16], strides = [1, 1]} : vector<64x256xf32> to vector<64x16xf32>
    %3 = vector.extract_strided_slice %0 {offsets = [0, 0], sizes = [64, 240], strides = [1, 1]} : vector<64x256xf32> to vector<64x240xf32>
    %4 = tpu.concatenate %2, %3 in 1 : vector<64x16xf32>, vector<64x240xf32> -> vector<64x256xf32>
    %5 = vector.extract_strided_slice %1 {offsets = [0, 0], sizes = [1, 256], strides = [1, 1]} : vector<4x256xf32> to vector<1x256xf32>
    %6 = vector.broadcast %5 : vector<1x256xf32> to vector<64x256xf32>
    %7 = arith.mulf %4, %6 : vector<64x256xf32>
    %8 = vector.extract_strided_slice %0 {offsets = [0, 16], sizes = [64, 240], strides = [1, 1]} : vector<64x256xf32> to vector<64x240xf32>
    %9 = vector.extract_strided_slice %0 {offsets = [0, 0], sizes = [64, 16], strides = [1, 1]} : vector<64x256xf32> to vector<64x16xf32>
    %10 = tpu.concatenate %8, %9 in 1 : vector<64x240xf32>, vector<64x16xf32> -> vector<64x256xf32>
    %11 = vector.extract_strided_slice %1 {offsets = [1, 0], sizes = [1, 256], strides = [1, 1]} : vector<4x256xf32> to vector<1x256xf32>
    %12 = vector.broadcast %11 : vector<1x256xf32> to vector<64x256xf32>
    %13 = arith.mulf %10, %12 : vector<64x256xf32>
    %14 = vector.extract_strided_slice %0 {offsets = [0, 255], sizes = [64, 1], strides = [1, 1]} : vector<64x256xf32> to vector<64x1xf32>
    %15 = vector.extract_strided_slice %0 {offsets = [0, 0], sizes = [64, 255], strides = [1, 1]} : vector<64x256xf32> to vector<64x255xf32>
    %16 = tpu.concatenate %14, %15 in 1 : vector<64x1xf32>, vector<64x255xf32> -> vector<64x256xf32>
    %17 = vector.extract_strided_slice %1 {offsets = [2, 0], sizes = [1, 256], strides = [1, 1]} : vector<4x256xf32> to vector<1x256xf32>
    %18 = vector.broadcast %17 : vector<1x256xf32> to vector<64x256xf32>
    %19 = arith.mulf %16, %18 : vector<64x256xf32>
    %20 = vector.extract_strided_slice %0 {offsets = [0, 1], sizes = [64, 255], strides = [1, 1]} : vector<64x256xf32> to vector<64x255xf32>
    %21 = vector.extract_strided_slice %0 {offsets = [0, 0], sizes = [64, 1], strides = [1, 1]} : vector<64x256xf32> to vector<64x1xf32>
    %22 = tpu.concatenate %20, %21 in 1 : vector<64x255xf32>, vector<64x1xf32> -> vector<64x256xf32>
    %23 = vector.extract_strided_slice %1 {offsets = [3, 0], sizes = [1, 256], strides = [1, 1]} : vector<4x256xf32> to vector<1x256xf32>
    %24 = vector.broadcast %23 : vector<1x256xf32> to vector<64x256xf32>
    %25 = arith.mulf %22, %24 : vector<64x256xf32>
    %26 = arith.addf %7, %13 : vector<64x256xf32>
    %27 = arith.addf %19, %25 : vector<64x256xf32>
    %28 = arith.addf %26, %27 : vector<64x256xf32>
    %c0_3 = arith.constant 0 : index
    %c0_4 = arith.constant 0 : index
    %29 = vector.load %arg2[%c0_3, %c0_4] : memref<64x1xf32, #tpu.memory_space<vmem>>, vector<64x1xf32>
    %30 = vector.broadcast %29 : vector<64x1xf32> to vector<64x256xf32>
    %31 = arith.mulf %28, %30 : vector<64x256xf32>
    %c0_5 = arith.constant 0 : index
    %c0_6 = arith.constant 0 : index
    %32 = vector.load %arg4[%c0_5, %c0_6] : memref<64x256xf32, #tpu.memory_space<vmem>>, vector<64x256xf32>
    tpu.vector_store %arg4[%c0_5, %c0_6], %31 {strides = array<i32>} : memref<64x256xf32, #tpu.memory_space<vmem>>, vector<64x256xf32>,
    return
  }
  func.func @transform_0(%arg0: i32) -> (i32, i32) {
    %c0_i32 = arith.constant 0 : i32
    %c0_i32_0 = arith.constant 0 : i32
    return %arg0, %c0_i32 : i32, i32
  }
  func.func @transform_1(%arg0: i32) -> (i32, i32) {
    %c0_i32 = arith.constant 0 : i32
    %c0_i32_0 = arith.constant 0 : i32
    return %arg0, %c0_i32 : i32, i32
  }
  func.func @transform_2(%arg0: i32) -> (i32, i32) {
    %c0_i32 = arith.constant 0 : i32
    %c0_i32_0 = arith.constant 0 : i32
    %c0_i32_1 = arith.constant 0 : i32
    return %c0_i32, %c0_i32_0 : i32, i32
  }
  func.func @transform_3(%arg0: i32) -> (i32, i32) {
    %c0_i32 = arith.constant 0 : i32
    %c0_i32_0 = arith.constant 0 : i32
    return %arg0, %c0_i32 : i32, i32
  }
}

</mosaic_0001>

<bundles_post_ra>
// kernel: tpu_custom_call.1
= control target key start
LH: loop header
LB: loop body
LE: loop exit
PB: predicated region body
PF: predicated region fallthrough
CT: control target
= control target key end

     0   :  { %8 = vsyncpa [#allocation3], 0  ;;  %s1664_s0 = inlined_call_operand.hbm [shape: f32[128,256], index: 0, kind: input, shape index: {}]   ;;  %s1665_s1 = inlined_call_operand.vmem [shape: f32[128,1], index: 1, kind: input, shape index: {}]   ;;  %s1666_s2 = inlined_call_operand.vmem [shape: f32[4,256], index: 2, kind: input, shape index: {}]   ;;  %s1667_s3 = inlined_call_operand.hbm [shape: f32[128,256], index: 3, kind: output, shape index: {}]  }
   0x1   :  { %10 = vsyncpa [#allocation3 + $0x1], 0 }
   0x2   :  { %11 = vsyncpa [#allocation4], 0 }
   0x3   :  { %13 = vsyncpa [#allocation4 + $0x1], 0  ;;  %s1110_s12 = smov 0   ;;  %s1112_s13 = smov 0  }
   0x4   :  { %s1114_s14 = smov 0   ;;  %s1116_s15 = smov 0  }
   0x5 LB: > { %s1131_s16 = sadd.s32 4294967295, %s1078_s15   ;;  %s904_s17 = sadd.s32 4294967294, %s1078_s15   ;;  %s1078_s15 = sphi %s1116_s15, %s1680_s15   ;;  %s1074_s14 = sphi %s1114_s14, %s1679_s14   ;;  %s1070_s13 = sphi %s1112_s13, %s1678_s13   ;;  %s1066_s12 = sphi %s1110_s12, %s1677_s12  }
   0x6   : > { %s1135_s18 = sadd.s32 1, %s1078_s15   ;;  %s26_s19 = sadd.s32 1, %s1074_s14 }
   0x7   : > { %s23_s20 = ssub.s32 %s1078_s15, %s1135_s18  ;;  %p33_p0 = scmp.ne.s32.totalorder %s1074_s14, %s1070_s13 }
   0x8   : > { %p24_p1 = scmp.eq.s32.totalorder %s23_s20, 0  ;;  %p34_p2 = scmp.eq.s32.totalorder %s1078_s15, 0 }
   0x9   : > { %p39_p3 = scmp.ne.s32.totalorder %s1070_s13, %s1066_s12  ;;  %p40_p4 = scmp.eq.s32.totalorder %s1131_s16, 0 }
   0xa   : > { %s1147_s21 = scalar_select %p24_p1, %s1074_s14, %s26_s19  }
   0xb   : > { %p1149_p5 = por %p34_p2, %p33_p0  ;;  %p1153_p6 = por %p40_p4, %p39_p3 }
   0xc   : > { %p110_p7 = scmp.eq.s32.totalorder %s1131_s16, 1  ;;  %p116_p8 = scmp.eq.s32.totalorder %s904_s17, 1 }
   0xd   : > { %p938_p10 = scmp.lt.s32.totalorder %s1078_s15, 2  ;;  %s139_s26 = sand.u32 1, %s1074_s14  }
   0xe   : > { %p1160_p11 = por %p110_p7, %p33_p0  ;;  %p1164_p12 = por %p116_p8, %p39_p3 }
   0xf   : > { %s923_s27 = sshll.u32 %s1078_s15, 11  ;;  %s907_s28 = sshll.u32 %s139_s26, 7 }
  0x10   : > { %s1671_s24 = scalar_select %p1160_p11, 1, 0 }
  0x11   : > { %s1672_s25 = scalar_select %p1164_p12, 1, 0 }
  0x12   : > { %s1173_s4 = scalar_lea.hbm %s1664_s0, %s923_s27  ;;  %s143_s5 = scalar_lea.vmem [#allocation2], %s907_s28 }
  0x13   : > { %s151_s6 = sshll.u32 %s143_s5, 4  ;;  %p1177_p13 = pnand %p938_p10, %p1149_p5  ;;  %s1181_s6 = int_to_ptr.vmem [resolvable:$true] %s151_s6 }
  0x14   : > { %s1183_s8 = scalar_lea.sflag [#allocation3], %s139_s26  ;;  %s982_s9 = scalar_lea.hbm %s1173_s4, 2048 }
  0x15   : > { %p983_p0 = scmp.ne.s32.totalorder %s1173_s4, %s982_s9  ;;  %p984_p1 = pneg %p1177_p13 }
  0x16   : > { %s987_s17 = scalar_lea.hbm %s1664_s0, 4096  ;;  %p988_p4 = scmp.lt.u32.totalorder %s1173_s4, %s1664_s0 }
  0x17   : > { %p985_p2 = pnand %p984_p1, %p983_p0  ;;  %p989_p5 = scmp.lt.u32.totalorder %s987_s17, %s982_s9 }
  0x18   : > { %p991_p8 = scmp.lt.u32.totalorder %s982_s9, %s1173_s4 }
  0x19   : > { %p986_p3 = pneg %p985_p2  ;;  %p990_p7 = por %p989_p5, %p988_p4 }
  0x1b   : > { %p992_p10 = por %p991_p8, %p990_p7 }
  0x1d   : > { %p993_p9 = pnand %p992_p10, %p986_p3 }
  0x1f   : > { %996 = shalt.err (!%p993_p9)
}
  0x20   : > { %s997_s22 = scalar_lea.vmem %s1181_s6, 2048  ;;  %s1080_s26 = smov [#allocation2]  }
  0x21   : > { %p998_p0 = scmp.ne.s32.totalorder %s1181_s6, %s997_s22  ;;  %s1002_s27 = sshll.u32 %s1080_s26, 4  ;;  %s1003_s27 = int_to_ptr.vmem [resolvable:$false] %s1002_s27 }
  0x22   : > { %s1004_s28 = scalar_lea.vmem %s1003_s27, 4096  ;;  %p1005_p11 = scmp.lt.s32.totalorder %s1181_s6, %s1003_s27 }
  0x23   : > { %p1000_p2 = pnand %p998_p0, %p984_p1  ;;  %p1006_p4 = scmp.lt.s32.totalorder %s1004_s28, %s997_s22 }
  0x25   : > { %p1001_p12 = pneg %p1000_p2  ;;  %p1007_p5 = por %p1006_p4, %p1005_p11 }
  0x27   : > { %p1008_p7 = pnand %p1007_p5, %p1001_p12 }
  0x29   : > { %1011 = shalt.err (!%p1008_p7)
}
  0x2a   : > { %s1081_s29 = smov 256   ;;  %s1082_s30 = smov 16  }
  0x2b   : > { %933 = dma.hbm_to_vmem [thread:$0]  (!%p1177_p13), %s1173_s4, 2048, %s1181_s6, %s1183_s8, %s1081_s29, %s1081_s29, %s1082_s30  }
  0x2c   : > { %p911_p9 = scmp.ge.s32.totalorder %s1078_s15, 1  ;;  %p168_p1 = scmp.lt.s32.totalorder %s1078_s15, 3 }
  0x2e   : > { %p169_p3 = pnand %p911_p9, %p168_p1 }
  0x2f   : > { %s1214_s5 = sand.u32 (!%p169_p3), 1, %s1070_s13  }
  0x30   : > { %172 = sbr.rel (%p169_p3) target bundleno = 344 (0x158), region = 32  ;;  %s912_s9 = sshll.u32 (!%p169_p3), %s1214_s5, 7 }
  0x31   : > { %s175_s10 = scalar_lea.sflag (!%p169_p3), [#allocation3], %s1214_s5  ;;  %s1220_s11 = scalar_lea.vmem (!%p169_p3), [#allocation2], %s912_s9 }
  0x37   : > { %1057 = dma.done.wait (%p1153_p6), %s175_s10, 2048  }
  0x38   : > { %1059 = vsyncadd (%p1153_p6), %s175_s10, 4294965248  ;;  %v1227_v0 = vld [vmem:[%s1220_s11 + $0x28] sm:$0xff]  ;;  %v1083_v2 = vmov 0   ;;  %s1084_s4 = smov 16   ;;  %v1237_v3 = vld [vmem:[%s1220_s11 + $0x38] sm:$0xff]  ;;  %s1085_s23 = smov 112   ;;  %v321_v27 = vlaneseq }
  0x39   : > { %v1230_v1 = vld [vmem:[%s1220_s11 + $0x8] sm:$0xff]  ;;  %981 = vset.pattern.permute.xlu1 %v1083_v2  ;;  %980 = vset.pattern.permute.xlu0 %v1083_v2  ;;  %v1240_v4 = vld [vmem:[%s1220_s11 + $0x18] sm:$0xff]  ;;  %v216_v9 = vld [vmem:[%s1220_s11 + $0x10] sm:$0xff]  ;;  %s1086_s6 = smov 1   ;;  %s1087_s7 = smov 127   ;;  %vm287_vm0 = vcmask 130048  }
  0x3a   : > { %243 = vrot.lane.b32.xlu1 %v1227_v0, %s1084_s4  ;;  %239 = vrot.lane.b32.xlu0 %v1230_v1, %s1084_s4  ;;  %v1247_v5 = vld [vmem:[%s1220_s11 + $0x58] sm:$0xff]  ;;  %v1250_v6 = vld [vmem:[%s1220_s11 + $0x48] sm:$0xff]  ;;  %s914_s8 = sshll.u32 %s1131_s16, 3  ;;  %v1321_v29 = vshrl.u32 %v321_v27, 7  ;;  %vm387_vm1 = vcmask 916480   ;;  %vm502_vm2 = vcmask 7168  }
  0x3b   : > { %v1257_v7 = vld [vmem:[%s1220_s11 + $0x78] sm:$0xff]  ;;  %v1260_v8 = vld [vmem:[%s1220_s11 + $0x68] sm:$0xff]  ;;  %v214_v10 = vld [vmem:[%s1220_s11] sm:$0xff]  ;;  %p208_p6 = scmp.lt.s32.totalorder %s914_s8, 15  ;;  %vm601_vm3 = vcmask 1039360   ;;  %s1580_s28 = scalar_lea.vmem [#allocation5], %s912_s9 }
  0x3c   : > { %v220_v11 = vld [vmem:[%s1220_s11 + $0x30] sm:$0xff]  ;;  %v218_v12 = vld [vmem:[%s1220_s11 + $0x20] sm:$0xff]  ;;  %v323_v38 = vsub.s32 0, %v1321_v29  ;;  %v327_v47 = vsub.s32 4, %v1321_v29  ;;  %v430_v48 = vsub.s32 1, %v1321_v29  ;;  %v434_v49 = vsub.s32 5, %v1321_v29 }
  0x3d   : > { %v224_v13 = vld [vmem:[%s1220_s11 + $0x50] sm:$0xff]  ;;  %v222_v14 = vld [vmem:[%s1220_s11 + $0x40] sm:$0xff]  ;;  %s1682_s8 = smov (!%p208_p6, %s914_s8), 15  ;;  %s925_s29 = sshll.u32 %s1131_s16, 11 }
  0x3e   : > { %245 = vrot.lane.b32.xlu1 %v1237_v3, %s1084_s4  ;;  %241 = vrot.lane.b32.xlu0 %v1240_v4, %s1084_s4  ;;  %v1279_v15 = vld [vmem:[%s1220_s11 + $0x70] sm:$0xff]  ;;  %v226_v16 = vld [vmem:[%s1220_s11 + $0x60] sm:$0xff]  ;;  %s915_s17 = sshll.u32 %s1682_s8, 3  ;;  %s819_s30 = sshll.u32 %s1580_s28, 4  ;;  %s1615_s30 = int_to_ptr.vmem [resolvable:$true] %s819_s30 }
  0x3f   : > { %s1314_s22 = scalar_lea.vmem %s1665_s1, %s915_s17  ;;  %v1334_v42 = vld [vmem:[%s1666_s2] sm:$0xff]  ;;  %s1613_s10 = scalar_lea.hbm %s1667_s3, %s925_s29 }
  0x40   : > { %v725_v23 = vld [vmem:[%s1314_s22 + $0x8] sm:$0xff]  ;;  %v724_v24 = vld [vmem:[%s1314_s22] sm:$0xff]  ;;  %v726_v28 = vld [vmem:[%s1314_s22 + $0x10] sm:$0xff]  ;;  %v324_v51 = vrot.slane %v1334_v42, %v323_v38  ;;  %v328_v59 = vrot.slane %v1334_v42, %v327_v47  ;;  %v431_v60 = vrot.slane %v1334_v42, %v430_v48  ;;  %v435_v61 = vrot.slane %v1334_v42, %v434_v49  ;;  %s805_s11 = scalar_lea.sflag [#allocation4], %s1214_s5  ;;  %p1674_p12 = scmp.ne.s32.totalorder %s1671_s24, 0 }
  0x41   : > { %v727_v32 = vld [vmem:[%s1314_s22 + $0x18] sm:$0xff]  ;;  %v728_v37 = vld [vmem:[%s1314_s22 + $0x20] sm:$0xff]  ;;  %v729_v41 = vld [vmem:[%s1314_s22 + $0x28] sm:$0xff] }
  0x42   : > { %249 = vrot.lane.b32.xlu1 %v1247_v5, %s1084_s4  ;;  %247 = vrot.lane.b32.xlu0 %v1250_v6, %s1084_s4  ;;  %v730_v50 = vld [vmem:[%s1314_s22 + $0x30] sm:$0xff]  ;;  %v731_v54 = vld [vmem:[%s1314_s22 + $0x38] sm:$0xff]  ;;  %v1363_v62 = vrot.slane %v324_v51, %v323_v38 }
  0x46   : > { %253 = vrot.lane.b32.xlu1 %v1257_v7, %s1084_s4  ;;  %251 = vrot.lane.b32.xlu0 %v1260_v8, %s1084_s4 }
  0x4a   : > { %273 = vrot.lane.b32.xlu1 %v216_v9, %s1084_s4  ;;  %271 = vrot.lane.b32.xlu0 %v214_v10, %s1084_s4 }
  0x4e   : > { %277 = vrot.lane.b32.xlu1 %v220_v11, %s1084_s4  ;;  %275 = vrot.lane.b32.xlu0 %v218_v12, %s1084_s4 }
  0x52   : > { %281 = vrot.lane.b32.xlu1 %v224_v13, %s1084_s4  ;;  %279 = vrot.lane.b32.xlu0 %v222_v14, %s1084_s4 }
  0x56   : > { %285 = vrot.lane.b32.xlu1 %v1279_v15, %s1084_s4  ;;  %283 = vrot.lane.b32.xlu0 %v226_v16, %s1084_s4 }
  0x5a   : > { %357 = vrot.lane.b32.xlu1 %v1230_v1, %s1085_s23  ;;  %355 = vrot.lane.b32.xlu0 %v214_v10, %s1085_s23 }
  0x5e   : > { %361 = vrot.lane.b32.xlu1 %v1240_v4, %s1085_s23  ;;  %359 = vrot.lane.b32.xlu0 %v216_v9, %s1085_s23 }
  0x62   : > { %365 = vrot.lane.b32.xlu1 %v1227_v0, %s1085_s23  ;;  %363 = vrot.lane.b32.xlu0 %v218_v12, %s1085_s23 }
  0x66   : > { %369 = vrot.lane.b32.xlu1 %v1237_v3, %s1085_s23  ;;  %367 = vrot.lane.b32.xlu0 %v220_v11, %s1085_s23 }
  0x6a   : > { %373 = vrot.lane.b32.xlu1 %v1250_v6, %s1085_s23  ;;  %371 = vrot.lane.b32.xlu0 %v222_v14, %s1085_s23 }
  0x6e   : > { %377 = vrot.lane.b32.xlu1 %v1247_v5, %s1085_s23  ;;  %375 = vrot.lane.b32.xlu0 %v224_v13, %s1085_s23 }
  0x72   : > { %381 = vrot.lane.b32.xlu1 %v1260_v8, %s1085_s23  ;;  %379 = vrot.lane.b32.xlu0 %v226_v16, %s1085_s23 }
  0x76   : > { %385 = vrot.lane.b32.xlu1 %v1257_v7, %s1085_s23  ;;  %383 = vrot.lane.b32.xlu0 %v1279_v15, %s1085_s23  ;;  %s1012_s23 = scalar_lea.vmem %s1615_s30, 2048 }
  0x77   : > { %p1013_p11 = scmp.ne.s32.totalorder %s1615_s30, %s1012_s23 }
  0x79   : > { %p1014_p13 = pnand %p1013_p11, %p1674_p12 }
  0x7a   : > { %464 = vrot.lane.b32.xlu1 %v1240_v4, %s1086_s6  ;;  %462 = vrot.lane.b32.xlu0 %v1230_v1, %s1086_s6 }
  0x7b   : > { %p1015_p8 = pneg %p1014_p13 }
  0x7e   : > { %468 = vrot.lane.b32.xlu1 %v1237_v3, %s1086_s6  ;;  %466 = vrot.lane.b32.xlu0 %v1227_v0, %s1086_s6 }
  0x82   : > { %472 = vrot.lane.b32.xlu1 %v1247_v5, %s1086_s6  ;;  %470 = vrot.lane.b32.xlu0 %v1250_v6, %s1086_s6 }
  0x86   : > { %476 = vrot.lane.b32.xlu1 %v1257_v7, %s1086_s6  ;;  %474 = vrot.lane.b32.xlu0 %v1260_v8, %s1086_s6 }
  0x8a   : > { %488 = vrot.lane.b32.xlu1 %v216_v9, %s1086_s6  ;;  %486 = vrot.lane.b32.xlu0 %v214_v10, %s1086_s6 }
  0x8e   : > { %492 = vrot.lane.b32.xlu1 %v220_v11, %s1086_s6  ;;  %490 = vrot.lane.b32.xlu0 %v218_v12, %s1086_s6 }
  0x92   : > { %496 = vrot.lane.b32.xlu1 %v224_v13, %s1086_s6  ;;  %494 = vrot.lane.b32.xlu0 %v222_v14, %s1086_s6 }
  0x96   : > { %500 = vrot.lane.b32.xlu1 %v1279_v15, %s1086_s6  ;;  %498 = vrot.lane.b32.xlu0 %v226_v16, %s1086_s6  ;;  %s1088_s6 = smov [#allocation5]  }
  0x9a   : > { %571 = vrot.lane.b32.xlu1 %v1230_v1, %s1087_s7  ;;  %569 = vrot.lane.b32.xlu0 %v214_v10, %s1087_s7 }
  0x9e   : > { %575 = vrot.lane.b32.xlu1 %v1240_v4, %s1087_s7  ;;  %573 = vrot.lane.b32.xlu0 %v216_v9, %s1087_s7 }
  0xa2   : > { %579 = vrot.lane.b32.xlu1 %v1227_v0, %s1087_s7  ;;  %577 = vrot.lane.b32.xlu0 %v218_v12, %s1087_s7 }
  0xa6   : > { %583 = vrot.lane.b32.xlu1 %v1237_v3, %s1087_s7  ;;  %581 = vrot.lane.b32.xlu0 %v220_v11, %s1087_s7 }
  0xaa   : > { %587 = vrot.lane.b32.xlu1 %v1250_v6, %s1087_s7  ;;  %585 = vrot.lane.b32.xlu0 %v222_v14, %s1087_s7  ;;  %v1379_v6 = vrot.slane %v431_v60, %v430_v48 }
  0xac   : > { %v244_v17 = vpop.permute.xlu1 %243  ;;  %v240_v18 = vpop.permute.xlu0 %239 }
  0xae   : > { %591 = vrot.lane.b32.xlu1 %v1247_v5, %s1087_s7  ;;  %589 = vrot.lane.b32.xlu0 %v224_v13, %s1087_s7  ;;  %v1377_v5 = vrot.slane %v328_v59, %v323_v38 }
  0xb0   : > { %v246_v19 = vpop.permute.xlu1 %245  ;;  %v242_v20 = vpop.permute.xlu0 %241 }
  0xb2   : > { %595 = vrot.lane.b32.xlu1 %v1260_v8, %s1087_s7  ;;  %593 = vrot.lane.b32.xlu0 %v226_v16, %s1087_s7 }
  0xb4   : > { %v250_v21 = vpop.permute.xlu1 %249  ;;  %v248_v22 = vpop.permute.xlu0 %247 }
  0xb6   : > { %599 = vrot.lane.b32.xlu1 %v1257_v7, %s1087_s7  ;;  %597 = vrot.lane.b32.xlu0 %v1279_v15, %s1087_s7  ;;  %v1381_v7 = vrot.slane %v435_v61, %v430_v48  ;;  %s1016_s7 = sshll.u32 %s1088_s6, 4  ;;  %s1017_s7 = int_to_ptr.vmem [resolvable:$false] %s1016_s7 }
  0xb7   : > { %s1018_s8 = scalar_lea.vmem %s1017_s7, 4096  ;;  %p1019_p10 = scmp.lt.s32.totalorder %s1615_s30, %s1017_s7 }
  0xb8   : > { %v254_v25 = vpop.permute.xlu1 %253  ;;  %v252_v26 = vpop.permute.xlu0 %251  ;;  %p1020_p0 = scmp.lt.s32.totalorder %s1018_s8, %s1012_s23 }
  0xba   : > { %739 = vperm.xlu1 %981, %v725_v23   ;;  %734 = vperm.xlu0 %980, %v724_v24   ;;  %p1021_p2 = por %p1020_p0, %p1019_p10 }
  0xbc   : > { %v274_v30 = vpop.permute.xlu1 %273  ;;  %v272_v31 = vpop.permute.xlu0 %271  ;;  %p1022_p4 = pnand %p1021_p2, %p1015_p8 }
  0xbd   : > { %v289_v33 = vsel %vm287_vm0, %v274_v30, %v242_v20  ;;  %v313_v34 = vsel %vm287_vm0, %v242_v20, %v274_v30  ;;  %v288_v35 = vsel %vm287_vm0, %v272_v31, %v240_v18  ;;  %v312_v36 = vsel %vm287_vm0, %v240_v18, %v272_v31 }
  0xbe   : > { %744 = vperm.xlu1 %981, %v726_v28   ;;  %749 = vperm.xlu0 %980, %v727_v32   ;;  %v339_v12 = vmul.f32 %v1363_v62, %v312_v36  ;;  %v340_v13 = vmul.f32 %v1377_v5, %v288_v35  ;;  %v342_v23 = vmul.f32 %v1377_v5, %v289_v33 }
  0xc0   : > { %v278_v39 = vpop.permute.xlu1 %277  ;;  %v276_v40 = vpop.permute.xlu0 %275 }
  0xc1   : > { %v1337_v43 = vsel %vm287_vm0, %v278_v39, %v246_v19  ;;  %v1340_v44 = vsel %vm287_vm0, %v246_v19, %v278_v39  ;;  %v290_v45 = vsel %vm287_vm0, %v276_v40, %v244_v17  ;;  %v314_v46 = vsel %vm287_vm0, %v244_v17, %v276_v40 }
  0xc2   : > { %754 = vperm.xlu1 %981, %v728_v37   ;;  %759 = vperm.xlu0 %980, %v729_v41   ;;  %v343_v35 = vmul.f32 %v1363_v62, %v314_v46  ;;  %v345_v48 = vmul.f32 %v1363_v62, %v1340_v44 }
  0xc4   : > { %v282_v52 = vpop.permute.xlu1 %281  ;;  %v280_v53 = vpop.permute.xlu0 %279 }
  0xc5   : > { %v1351_v55 = vsel %vm287_vm0, %v282_v52, %v250_v21  ;;  %v1354_v56 = vsel %vm287_vm0, %v250_v21, %v282_v52  ;;  %v1357_v57 = vsel %vm287_vm0, %v280_v53, %v248_v22  ;;  %v316_v58 = vsel %vm287_vm0, %v248_v22, %v280_v53 }
  0xc6   : > { %764 = vperm.xlu1 %981, %v730_v50   ;;  %769 = vperm.xlu0 %980, %v731_v54   ;;  %v341_v22 = vmul.f32 %v1363_v62, %v313_v34  ;;  %v344_v34 = vmul.f32 %v1377_v5, %v290_v45  ;;  %v346_v45 = vmul.f32 %v1377_v5, %v1337_v43 }
  0xc7   : > { %v347_v60 = vmul.f32 %v1363_v62, %v316_v58  ;;  %v348_v44 = vmul.f32 %v1377_v5, %v1357_v57  ;;  %v349_v58 = vmul.f32 %v1363_v62, %v1354_v56  ;;  %v350_v57 = vmul.f32 %v1377_v5, %v1351_v55 }
  0xc8   : > { %v286_v63 = vpop.permute.xlu1 %285  ;;  %v284_v0 = vpop.permute.xlu0 %283 }
  0xc9   : > { %v1366_v1 = vsel %vm287_vm0, %v286_v63, %v254_v25  ;;  %v1369_v2 = vsel %vm287_vm0, %v254_v25, %v286_v63  ;;  %v1372_v3 = vsel %vm287_vm0, %v284_v0, %v252_v26  ;;  %v1375_v4 = vsel %vm287_vm0, %v252_v26, %v284_v0 }
  0xca   : > { %v351_v56 = vmul.f32 %v1363_v62, %v1375_v4  ;;  %v352_v55 = vmul.f32 %v1377_v5, %v1372_v3  ;;  %v353_v4 = vmul.f32 %v1363_v62, %v1369_v2  ;;  %v354_v3 = vmul.f32 %v1377_v5, %v1366_v1 }
  0xcc   : > { %v358_v8 = vpop.permute.xlu1 %357  ;;  %v356_v9 = vpop.permute.xlu0 %355 }
  0xcd   : > { %v388_v10 = vsel %vm387_vm1, %v356_v9, %v358_v8  ;;  %v420_v11 = vsel %vm387_vm1, %v358_v8, %v356_v9 }
  0xce   : > { %v446_v14 = vmul.f32 %v1379_v6, %v388_v10  ;;  %v447_v15 = vmul.f32 %v1381_v7, %v420_v11 }
  0xd0   : > { %v1389_v16 = vadd.f32 %v446_v14, %v339_v12  ;;  %v1391_v17 = vadd.f32 %v447_v15, %v340_v13  ;;  %v362_v18 = vpop.permute.xlu1 %361  ;;  %v360_v19 = vpop.permute.xlu0 %359 }
  0xd1   : > { %v389_v20 = vsel %vm387_vm1, %v360_v19, %v362_v18  ;;  %v421_v21 = vsel %vm387_vm1, %v362_v18, %v360_v19 }
  0xd2   : > { %v448_v24 = vmul.f32 %v1379_v6, %v389_v20  ;;  %v449_v25 = vmul.f32 %v1381_v7, %v421_v21 }
  0xd4   : > { %v1399_v26 = vadd.f32 %v448_v24, %v341_v22  ;;  %v1401_v27 = vadd.f32 %v449_v25, %v342_v23  ;;  %v366_v28 = vpop.permute.xlu1 %365  ;;  %v364_v30 = vpop.permute.xlu0 %363 }
  0xd5   : > { %v390_v31 = vsel %vm387_vm1, %v364_v30, %v366_v28  ;;  %v422_v32 = vsel %vm387_vm1, %v366_v28, %v364_v30 }
  0xd6   : > { %v450_v33 = vmul.f32 %v1379_v6, %v390_v31  ;;  %v451_v36 = vmul.f32 %v1381_v7, %v422_v32 }
  0xd8   : > { %v1409_v37 = vadd.f32 %v450_v33, %v343_v35  ;;  %v1411_v38 = vadd.f32 %v451_v36, %v344_v34  ;;  %v370_v39 = vpop.permute.xlu1 %369  ;;  %v368_v40 = vpop.permute.xlu0 %367 }
  0xd9   : > { %v391_v41 = vsel %vm387_vm1, %v368_v40, %v370_v39  ;;  %v423_v47 = vsel %vm387_vm1, %v370_v39, %v368_v40 }
  0xda   : > { %v452_v46 = vmul.f32 %v1379_v6, %v391_v41  ;;  %v453_v49 = vmul.f32 %v1381_v7, %v423_v47 }
  0xdc   : > { %v1421_v50 = vadd.f32 %v452_v46, %v345_v48  ;;  %v1423_v51 = vadd.f32 %v453_v49, %v346_v45  ;;  %v374_v52 = vpop.permute.xlu1 %373  ;;  %v372_v53 = vpop.permute.xlu0 %371 }
  0xdd   : > { %v392_v54 = vsel %vm387_vm1, %v372_v53, %v374_v52  ;;  %v424_v59 = vsel %vm387_vm1, %v374_v52, %v372_v53 }
  0xde   : > { %v454_v43 = vmul.f32 %v1379_v6, %v392_v54  ;;  %v455_v61 = vmul.f32 %v1381_v7, %v424_v59 }
  0xe0   : > { %v1432_v63 = vadd.f32 %v454_v43, %v347_v60  ;;  %v1434_v0 = vadd.f32 %v455_v61, %v348_v44  ;;  %v378_v8 = vpop.permute.xlu1 %377  ;;  %v376_v9 = vpop.permute.xlu0 %375 }
  0xe1   : > { %v393_v10 = vsel %vm387_vm1, %v376_v9, %v378_v8  ;;  %v425_v11 = vsel %vm387_vm1, %v378_v8, %v376_v9 }
  0xe2   : > { %v456_v12 = vmul.f32 %v1379_v6, %v393_v10  ;;  %v457_v13 = vmul.f32 %v1381_v7, %v425_v11  ;;  %v537_v10 = vsub.s32 2, %v1321_v29  ;;  %v541_v11 = vsub.s32 6, %v1321_v29 }
  0xe4   : > { %v1444_v14 = vadd.f32 %v456_v12, %v349_v58  ;;  %v1446_v15 = vadd.f32 %v457_v13, %v350_v57  ;;  %v382_v18 = vpop.permute.xlu1 %381  ;;  %v380_v19 = vpop.permute.xlu0 %379  ;;  %v644_v58 = vsub.s32 3, %v1321_v29  ;;  %v648_v57 = vsub.s32 7, %v1321_v29 }
  0xe5   : > { %v394_v20 = vsel %vm387_vm1, %v380_v19, %v382_v18  ;;  %v426_v21 = vsel %vm387_vm1, %v382_v18, %v380_v19  ;;  %v538_v12 = vrot.slane %v1334_v42, %v537_v10  ;;  %v542_v13 = vrot.slane %v1334_v42, %v541_v11 }
  0xe6   : > { %v458_v22 = vmul.f32 %v1379_v6, %v394_v20  ;;  %v459_v23 = vmul.f32 %v1381_v7, %v426_v21  ;;  %v645_v20 = vrot.slane %v1334_v42, %v644_v58  ;;  %v649_v21 = vrot.slane %v1334_v42, %v648_v57 }
  0xe8   : > { %v386_v24 = vpop.permute.xlu1 %385  ;;  %v384_v25 = vpop.permute.xlu0 %383  ;;  %v1456_v28 = vadd.f32 %v458_v22, %v351_v56  ;;  %v1458_v30 = vadd.f32 %v459_v23, %v352_v55  ;;  %v1492_v56 = vrot.slane %v538_v12, %v537_v10  ;;  %v1494_v55 = vrot.slane %v542_v13, %v537_v10 }
  0xe9   : > { %v395_v31 = vsel %vm387_vm1, %v384_v25, %v386_v24  ;;  %v427_v32 = vsel %vm387_vm1, %v386_v24, %v384_v25  ;;  %v1500_v25 = vrot.slane %v645_v20, %v644_v58 }
  0xea   : > { %v460_v35 = vmul.f32 %v1379_v6, %v395_v31  ;;  %v461_v34 = vmul.f32 %v1381_v7, %v427_v32  ;;  %v1502_v31 = vrot.slane %v649_v21, %v644_v58 }
  0xec   : > { %v465_v33 = vpop.permute.xlu1 %464  ;;  %v463_v36 = vpop.permute.xlu0 %462  ;;  %v1468_v39 = vadd.f32 %v460_v35, %v353_v4  ;;  %v1470_v40 = vadd.f32 %v461_v34, %v354_v3 }
  0xf0   : > { %v469_v41 = vpop.permute.xlu1 %468  ;;  %v467_v47 = vpop.permute.xlu0 %466 }
  0xf4   : > { %v473_v48 = vpop.permute.xlu1 %472  ;;  %v471_v45 = vpop.permute.xlu0 %470 }
  0xf8   : > { %v1472_v46 = vpop.permute.xlu1 %476  ;;  %v1474_v62 = vpop.permute.xlu0 %474 }
  0xfc   : > { %v489_v2 = vpop.permute.xlu1 %488  ;;  %v487_v1 = vpop.permute.xlu0 %486 }
  0xfd   : > { %v504_v22 = vsel %vm502_vm2, %v489_v2, %v465_v33  ;;  %v528_v29 = vsel %vm502_vm2, %v465_v33, %v489_v2  ;;  %v503_v23 = vsel %vm502_vm2, %v487_v1, %v463_v36  ;;  %v527_v24 = vsel %vm502_vm2, %v463_v36, %v487_v1 }
  0xfe   : > { %v555_v42 = vmul.f32 %v1492_v56, %v528_v29  ;;  %v556_v3 = vmul.f32 %v1494_v55, %v504_v22  ;;  %v553_v35 = vmul.f32 %v1492_v56, %v527_v24  ;;  %v554_v34 = vmul.f32 %v1494_v55, %v503_v23 }
 0x100   : > { %v493_v5 = vpop.permute.xlu1 %492  ;;  %v491_v6 = vpop.permute.xlu0 %490 }
 0x101   : > { %v506_v10 = vsel %vm502_vm2, %v493_v5, %v469_v41  ;;  %v530_v11 = vsel %vm502_vm2, %v469_v41, %v493_v5  ;;  %v505_v58 = vsel %vm502_vm2, %v491_v6, %v467_v47  ;;  %v529_v57 = vsel %vm502_vm2, %v467_v47, %v491_v6 }
 0x102   : > { %v559_v5 = vmul.f32 %v1492_v56, %v530_v11  ;;  %v560_v47 = vmul.f32 %v1494_v55, %v506_v10  ;;  %v557_v6 = vmul.f32 %v1492_v56, %v529_v57 }
 0x104   : > { %v497_v49 = vpop.permute.xlu1 %496  ;;  %v495_v7 = vpop.permute.xlu0 %494 }
 0x105   : > { %v508_v12 = vsel %vm502_vm2, %v497_v49, %v473_v48  ;;  %v532_v13 = vsel %vm502_vm2, %v473_v48, %v497_v49  ;;  %v507_v20 = vsel %vm502_vm2, %v495_v7, %v471_v45  ;;  %v558_v48 = vmul.f32 %v1494_v55, %v505_v58 }
 0x106   : > { %v563_v23 = vmul.f32 %v1492_v56, %v532_v13  ;;  %v564_v24 = vmul.f32 %v1494_v55, %v508_v12 }
 0x108   : > { %v1476_v52 = vpop.permute.xlu1 %500  ;;  %v1478_v53 = vpop.permute.xlu0 %498 }
 0x109   : > { %v534_v57 = vsel %vm502_vm2, %v1472_v46, %v1476_v52 }
 0x10c   : > { %v572_v54 = vpop.permute.xlu1 %571  ;;  %v570_v59 = vpop.permute.xlu0 %569 }
 0x10d   : > { %v602_v33 = vsel %vm601_vm3, %v570_v59, %v572_v54  ;;  %v634_v2 = vsel %vm601_vm3, %v572_v54, %v570_v59  ;;  %v531_v54 = vsel %vm502_vm2, %v471_v45, %v495_v7 }
 0x10e   : > { %v660_v59 = vmul.f32 %v1500_v25, %v602_v33  ;;  %v561_v33 = vmul.f32 %v1492_v56, %v531_v54 }
 0x110   : > { %v576_v60 = vpop.permute.xlu1 %575  ;;  %v574_v44 = vpop.permute.xlu0 %573 }
 0x111   : > { %v603_v36 = vsel %vm601_vm3, %v574_v44, %v576_v60  ;;  %v635_v1 = vsel %vm601_vm3, %v576_v60, %v574_v44  ;;  %v661_v60 = vmul.f32 %v1502_v31, %v634_v2  ;;  %v562_v2 = vmul.f32 %v1494_v55, %v507_v20 }
 0x112   : > { %v662_v44 = vmul.f32 %v1500_v25, %v603_v36  ;;  %v663_v41 = vmul.f32 %v1502_v31, %v635_v1  ;;  %v692_v36 = vadd.f32 %v660_v59, %v553_v35 }
 0x113   : > { %v693_v1 = vadd.f32 %v661_v60, %v554_v34 }
 0x114   : > { %v580_v43 = vpop.permute.xlu1 %579  ;;  %v578_v61 = vpop.permute.xlu0 %577  ;;  %v694_v10 = vadd.f32 %v662_v44, %v555_v42  ;;  %v695_v11 = vadd.f32 %v663_v41, %v556_v3  ;;  %v509_v42 = vsel %vm502_vm2, %v1478_v53, %v1474_v62  ;;  %v533_v3 = vsel %vm502_vm2, %v1474_v62, %v1478_v53 }
 0x115   : > { %v604_v45 = vsel %vm601_vm3, %v578_v61, %v580_v43  ;;  %v636_v7 = vsel %vm601_vm3, %v580_v43, %v578_v61  ;;  %v708_v62 = vadd.f32 %v692_v36, %v1389_v16  ;;  %v709_v53 = vadd.f32 %v693_v1, %v1391_v17 }
 0x116   : > { %v664_v58 = vmul.f32 %v1500_v25, %v604_v45  ;;  %v665_v43 = vmul.f32 %v1502_v31, %v636_v7  ;;  %v710_v20 = vadd.f32 %v694_v10, %v1399_v26  ;;  %v711_v54 = vadd.f32 %v695_v11, %v1401_v27 }
 0x118   : > { %v584_v8 = vpop.permute.xlu1 %583  ;;  %v582_v9 = vpop.permute.xlu0 %581  ;;  %v696_v59 = vadd.f32 %v664_v58, %v557_v6  ;;  %v697_v60 = vadd.f32 %v665_v43, %v558_v48  ;;  %v566_v58 = vmul.f32 %v1494_v55, %v509_v42 }
 0x119   : > { %v605_v22 = vsel %vm601_vm3, %v582_v9, %v584_v8  ;;  %v637_v29 = vsel %vm601_vm3, %v584_v8, %v582_v9  ;;  %v510_v9 = vsel %vm502_vm2, %v1476_v52, %v1472_v46 }
 0x11a   : > { %v666_v61 = vmul.f32 %v1500_v25, %v605_v22  ;;  %v667_v8 = vmul.f32 %v1502_v31, %v637_v29  ;;  %v712_v22 = vadd.f32 %v696_v59, %v1409_v37  ;;  %v713_v29 = vadd.f32 %v697_v60, %v1411_v38 }
 0x11c   : > { %v1486_v18 = vpop.permute.xlu1 %587  ;;  %v1488_v19 = vpop.permute.xlu0 %585  ;;  %v698_v44 = vadd.f32 %v666_v61, %v559_v5  ;;  %v699_v41 = vadd.f32 %v667_v8, %v560_v47 }
 0x11d   : > { %v606_v35 = vsel %vm601_vm3, %v1488_v19, %v1486_v18  ;;  %v638_v34 = vsel %vm601_vm3, %v1486_v18, %v1488_v19 }
 0x11e   : > { %v668_v18 = vmul.f32 %v1500_v25, %v606_v35  ;;  %v669_v19 = vmul.f32 %v1502_v31, %v638_v34  ;;  %v714_v36 = vadd.f32 %v698_v44, %v1421_v50  ;;  %v715_v1 = vadd.f32 %v699_v41, %v1423_v51 }
 0x11f   : > { %v567_v35 = vmul.f32 %v1492_v56, %v534_v57  ;;  %v568_v34 = vmul.f32 %v1494_v55, %v510_v9 }
 0x120   : > { %v592_v32 = vpop.permute.xlu1 %591  ;;  %v590_v4 = vpop.permute.xlu0 %589 }
 0x121   : > { %v607_v12 = vsel %vm601_vm3, %v590_v4, %v592_v32  ;;  %v639_v46 = vsel %vm601_vm3, %v592_v32, %v590_v4 }
 0x122   : > { %v670_v32 = vmul.f32 %v1500_v25, %v607_v12  ;;  %v671_v4 = vmul.f32 %v1502_v31, %v639_v46 }
 0x124   : > { %v596_v49 = vpop.permute.xlu1 %595  ;;  %v594_v21 = vpop.permute.xlu0 %593  ;;  %v702_v37 = vadd.f32 %v670_v32, %v563_v23  ;;  %v703_v38 = vadd.f32 %v671_v4, %v564_v24 }
 0x125   : > { %v608_v26 = vsel %vm601_vm3, %v594_v21, %v596_v49  ;;  %v640_v27 = vsel %vm601_vm3, %v596_v49, %v594_v21  ;;  %v700_v49 = vadd.f32 %v668_v18, %v561_v33  ;;  %v701_v21 = vadd.f32 %v669_v19, %v562_v2 }
 0x126   : > { %v672_v10 = vmul.f32 %v1500_v25, %v608_v26  ;;  %v673_v11 = vmul.f32 %v1502_v31, %v640_v27  ;;  %v565_v2 = vmul.f32 %v1492_v56, %v533_v3  ;;  %v718_v56 = vadd.f32 %v702_v37, %v1444_v14 }
 0x127   : > { %v719_v55 = vadd.f32 %v703_v38, %v1446_v15 }
 0x128   : > { %v600_v52 = vpop.permute.xlu1 %599  ;;  %v598_v13 = vpop.permute.xlu0 %597  ;;  %v704_v3 = vadd.f32 %v672_v10, %v565_v2  ;;  %v705_v42 = vadd.f32 %v673_v11, %v566_v58 }
 0x129   : > { %v609_v16 = vsel %vm601_vm3, %v598_v13, %v600_v52  ;;  %v641_v17 = vsel %vm601_vm3, %v600_v52, %v598_v13 }
 0x12a   : > { %v674_v50 = vmul.f32 %v1500_v25, %v609_v16  ;;  %v675_v51 = vmul.f32 %v1502_v31, %v641_v17  ;;  %v716_v25 = vadd.f32 %v700_v49, %v1432_v63  ;;  %v717_v31 = vadd.f32 %v701_v21, %v1434_v0 }
 0x12c   : > { %v706_v9 = vadd.f32 %v674_v50, %v567_v35  ;;  %v707_v57 = vadd.f32 %v675_v51, %v568_v34 }
 0x12e   : > { %v722_v15 = vadd.f32 %v706_v9, %v1468_v39 }
 0x139   : > { %v740_v6 = vpop.permute.xlu1 %739  ;;  %v735_v5 = vpop.permute.xlu0 %734 }
 0x13a   : > { %v774_v47 = vmul.f32 %v740_v6, %v710_v20  ;;  %v775_v48 = vmul.f32 %v740_v6, %v711_v54  ;;  %v772_v45 = vmul.f32 %v735_v5, %v708_v62  ;;  %v773_v7 = vmul.f32 %v735_v5, %v709_v53 }
 0x13b   : > { %v720_v20 = vadd.f32 %v704_v3, %v1456_v28  ;;  %v721_v54 = vadd.f32 %v705_v42, %v1458_v30  ;;  %v723_v62 = vadd.f32 %v707_v57, %v1470_v40 }
 0x13c   : > { %790 = vst [vmem:[%s1580_s28 + $0x10] sm:$0xff] %v774_v47  ;;  %791 = vst [vmem:[%s1580_s28 + $0x18] sm:$0xff] %v775_v48 }
 0x13d   : > { %788 = vst [vmem:[%s1580_s28] sm:$0xff] %v772_v45  ;;  %789 = vst [vmem:[%s1580_s28 + $0x8] sm:$0xff] %v773_v7  ;;  %v745_v33 = vpop.permute.xlu1 %744  ;;  %v750_v8 = vpop.permute.xlu0 %749 }
 0x13e   : > { %v776_v43 = vmul.f32 %v745_v33, %v712_v22  ;;  %v777_v61 = vmul.f32 %v745_v33, %v713_v29  ;;  %v778_v23 = vmul.f32 %v750_v8, %v714_v36  ;;  %v779_v24 = vmul.f32 %v750_v8, %v715_v1 }
 0x140   : > { %792 = vst [vmem:[%s1580_s28 + $0x20] sm:$0xff] %v776_v43  ;;  %793 = vst [vmem:[%s1580_s28 + $0x28] sm:$0xff] %v777_v61 }
 0x141   : > { %794 = vst [vmem:[%s1580_s28 + $0x30] sm:$0xff] %v778_v23  ;;  %795 = vst [vmem:[%s1580_s28 + $0x38] sm:$0xff] %v779_v24  ;;  %v755_v12 = vpop.permute.xlu1 %754  ;;  %v760_v52 = vpop.permute.xlu0 %759 }
 0x142   : > { %v780_v63 = vmul.f32 %v755_v12, %v716_v25  ;;  %v781_v46 = vmul.f32 %v755_v12, %v717_v31  ;;  %v782_v0 = vmul.f32 %v760_v52, %v718_v56  ;;  %v783_v13 = vmul.f32 %v760_v52, %v719_v55 }
 0x144   : > { %796 = vst [vmem:[%s1580_s28 + $0x40] sm:$0xff] %v780_v63  ;;  %797 = vst [vmem:[%s1580_s28 + $0x48] sm:$0xff] %v781_v46 }
 0x145   : > { %798 = vst [vmem:[%s1580_s28 + $0x50] sm:$0xff] %v782_v0  ;;  %799 = vst [vmem:[%s1580_s28 + $0x58] sm:$0xff] %v783_v13  ;;  %v765_v14 = vpop.permute.xlu1 %764  ;;  %v770_v60 = vpop.permute.xlu0 %769 }
 0x146   : > { %v784_v53 = vmul.f32 %v765_v14, %v720_v20  ;;  %v785_v59 = vmul.f32 %v765_v14, %v721_v54  ;;  %v786_v28 = vmul.f32 %v770_v60, %v722_v15  ;;  %v787_v30 = vmul.f32 %v770_v60, %v723_v62 }
 0x148   : > { %800 = vst [vmem:[%s1580_s28 + $0x60] sm:$0xff] %v784_v53  ;;  %801 = vst [vmem:[%s1580_s28 + $0x68] sm:$0xff] %v785_v59 }
 0x149   : > { %802 = vst [vmem:[%s1580_s28 + $0x70] sm:$0xff] %v786_v28  ;;  %803 = vst [vmem:[%s1580_s28 + $0x78] sm:$0xff] %v787_v30 }
 0x14a   : > { %1025 = shalt.err (!%p1022_p4)
}
 0x14b   : > { %s1026_s17 = scalar_lea.hbm %s1613_s10, 2048  ;;  %s1030_s22 = scalar_lea.hbm %s1667_s3, 4096 }
 0x14c   : > { %p1027_p5 = scmp.ne.s32.totalorder %s1613_s10, %s1026_s17  ;;  %p1031_p1 = scmp.lt.u32.totalorder %s1613_s10, %s1667_s3 }
 0x14d   : > { %p1032_p3 = scmp.lt.u32.totalorder %s1030_s22, %s1026_s17  ;;  %p1034_p11 = scmp.lt.u32.totalorder %s1026_s17, %s1613_s10 }
 0x14e   : > { %p1028_p7 = pnand %p1027_p5, %p1674_p12 }
 0x14f   : > { %p1033_p6 = por %p1032_p3, %p1031_p1 }
 0x150   : > { %p1029_p9 = pneg %p1028_p7 }
 0x151   : > { %p1035_p13 = por %p1034_p11, %p1033_p6 }
 0x153   : > { %p1036_p8 = pnand %p1035_p13, %p1029_p9 }
 0x155   : > { %1039 = shalt.err (!%p1036_p8)
}
 0x156   : > { %s1089_s28 = smov 256  }
 0x157   : > { %928 = dma.vmem_to_hbm [thread:$0]  (%p1674_p12), %s1615_s30, 2048, %s1613_s10, %s805_s11, %s1089_s28, %s1089_s28, %s1084_s4  }
 0x158 PF: > { %s834_s29 = sand.u32 1, %s1066_s12   ;;  %p1675_p10 = scmp.ne.s32.totalorder %s1672_s25, 0 }
 0x159   : > { %p1676_p0 = scmp.ge.s32.totalorder %s1078_s15, 2  ;;  %s835_s16 = scalar_lea.sflag [#allocation4], %s834_s29 }
 0x15b   : > { %p935_p2 = pnand %p1676_p0, %p1675_p10 }
 0x15d   : > { %1061 = dma.done.wait (!%p935_p2), %s835_s16, 2048  }
 0x15e   : > { %1063 = vsyncadd (!%p935_p2), %s835_s16, 4294965248  ;;  %p16_p4 = scmp.ge.s32.totalorder %s1135_s18, 4   ;;  %s1677_s12 = smov %s1070_s13 }
 0x15f   : > { %s1678_s13 = smov %s1074_s14  ;;  %s1679_s14 = smov %s1147_s21 }
 0x160   : > { %s1680_s15 = smov %s1135_s18  ;;  %18 = sbr.rel (!%p16_p4) target bundleno = 5 (0x5), region = 80 }
 0x167   :  { %840 = vsyncpa [#allocation3], 1 }
 0x168   :  { %842 = vsyncpa [#allocation3 + $0x1], 1 }
 0x169   :  { %843 = vsyncpa [#allocation4], 1 }
 0x16a   :  { %845 = vsyncpa [#allocation4 + $0x1], 1 }

</bundles_post_ra>
